<compile_context>
chip_gen: v5e
topology: v5e:2x2
jax: 0.10.0
libtpu: 0.0.40
codegen_flags: <defaults>
</compile_context>

<pallas_src>
import functools

import jax
import jax.numpy as jnp
from jax.experimental import pallas as pl
from jax.experimental.pallas import tpu as pltpu

LANE = 128
SUBLANE = 8


def _round_up(n, m):
    return ((n + m - 1) // m) * m


def qnetwork_kernel(x_ref, w1_ref, b1_ref, w2_ref, b2_ref, w3_ref, b3_ref, o_ref):
    """One batch tile of the fused 3-layer MLP. Weights are bf16, accumulation f32."""
    x = x_ref[...].astype(jnp.bfloat16)

    # fc1 + ReLU (K padded to 128; zero rows in w1 contribute nothing)
    h1 = jnp.dot(x, w1_ref[...], preferred_element_type=jnp.float32) + b1_ref[...]
    h1 = jnp.maximum(h1, 0.0)

    # fc2 + ReLU (256x256, single MXU-friendly pass)
    h2 = jnp.dot(h1.astype(jnp.bfloat16), w2_ref[...],
                 preferred_element_type=jnp.float32) + b2_ref[...]
    h2 = jnp.maximum(h2, 0.0)

    # fc3 (output padded to 128 lanes -> unmasked, lane-dense store)
    out = jnp.dot(h2.astype(jnp.bfloat16), w3_ref[...],
                  preferred_element_type=jnp.float32) + b3_ref[...]
    o_ref[...] = out.astype(o_ref.dtype)


def prepare_params(w1, b1, w2, b2, w3, b3):
    """One-time (outside the hot path) padding + bf16 cast of the parameters.

    Inputs use (in_features, out_features) weight layout and (1, out) / (out,) biases.
    Returns padded params and the logical output_dim.
    """
    d_in, hidden = w1.shape
    d_out = w3.shape[1]
    d_in_p = _round_up(d_in, LANE)    # pad fc1 contraction depth to 128
    d_out_p = _round_up(d_out, LANE)  # pad fc3 outputs to 128 lanes

    w1p = jnp.zeros((d_in_p, hidden), jnp.bfloat16).at[:d_in, :].set(
        w1.astype(jnp.bfloat16))
    w2p = w2.astype(jnp.bfloat16)
    w3p = jnp.zeros((hidden, d_out_p), jnp.bfloat16).at[:, :d_out].set(
        w3.astype(jnp.bfloat16))

    b1p = jnp.asarray(b1, jnp.float32).reshape(1, hidden)
    b2p = jnp.asarray(b2, jnp.float32).reshape(1, hidden)
    b3p = jnp.zeros((1, d_out_p), jnp.float32).at[:, :d_out].set(
        jnp.asarray(b3, jnp.float32).reshape(1, d_out))

    return (w1p, b1p, w2p, b2p, w3p, b3p), d_out


@functools.partial(jax.jit, static_argnames=("out_dim", "tb"))
def qnetwork_forward(x, w1, b1, w2, b2, w3, b3, *, out_dim, tb=512):
    """x: (batch, input_dim) f32. Padded/bf16 params from prepare_params."""
    batch, d_in = x.shape
    d_in_p = w1.shape[0]
    hidden = w1.shape[1]
    d_out_p = w3.shape[1]

    # Pick a batch tile: single tile if the (sublane-rounded) batch is small,
    # otherwise TB-sized tiles with weights resident in VMEM across the grid.
    bp = _round_up(batch, SUBLANE)
    if bp <= tb:
        tbl = bp
        bpad = bp
    else:
        tbl = tb
        bpad = _round_up(batch, tb)

    # Zero-pad batch rows and feature columns (padded K rows of w1 are zero too).
    xp = jnp.zeros((bpad, d_in_p), jnp.float32).at[:batch, :d_in].set(x)

    grid = (bpad // tbl,)

    out_padded = pl.pallas_call(
        qnetwork_kernel,
        out_shape=jax.ShapeDtypeStruct((bpad, d_out_p), jnp.float32),
        grid=grid,
        in_specs=[
            pl.BlockSpec((tbl, d_in_p), lambda i: (i, 0)),       # x: tiled over batch
            pl.BlockSpec((d_in_p, hidden), lambda i: (0, 0)),    # w1: VMEM-resident
            pl.BlockSpec((1, hidden), lambda i: (0, 0)),         # b1
            pl.BlockSpec((hidden, hidden), lambda i: (0, 0)),    # w2
            pl.BlockSpec((1, hidden), lambda i: (0, 0)),         # b2
            pl.BlockSpec((hidden, d_out_p), lambda i: (0, 0)),   # w3 (lane-padded)
            pl.BlockSpec((1, d_out_p), lambda i: (0, 0)),        # b3 (lane-padded)
        ],
        out_specs=pl.BlockSpec((tbl, d_out_p), lambda i: (i, 0)),
        compiler_params=pltpu.CompilerParams(
            dimension_semantics=("parallel",),   # shard batch tiles across TCs (v7x)
        ),
    )(xp, w1, b1, w2, b2, w3, b3)

    # Slice back to the logical (batch, output_dim) result.
    return out_padded[:batch, :out_dim]


def init_linear_params(key, in_features, out_features):
    """nn.Linear-default-style init. W is (in, out) (transposed vs PyTorch), b is (1, out)."""
    k_w, k_b = jax.random.split(key)
    bound = 1.0 / jnp.sqrt(jnp.float32(in_features))
    w = jax.random.uniform(k_w, (in_features, out_features),
                           minval=-bound, maxval=bound, dtype=jnp.float32)
    b = jax.random.uniform(k_b, (1, out_features),
                           minval=-bound, maxval=bound, dtype=jnp.float32)
    return w, b


if __name__ == "__main__":
    input_dim = 16   # small state vector
    output_dim = 4   # number of discrete actions
    batch = 8
    hidden = 256     # fixed by the module definition

    key = jax.random.PRNGKey(0)
    k_x, k1, k2, k3 = jax.random.split(key, 4)

    x = jax.random.normal(k_x, (batch, input_dim), dtype=jnp.float32)
    w1, b1 = init_linear_params(k1, input_dim, hidden)
    w2, b2 = init_linear_params(k2, hidden, hidden)
    w3, b3 = init_linear_params(k3, hidden, output_dim)

    (w1p, b1p, w2p, b2p, w3p, b3p), out_dim = prepare_params(w1, b1, w2, b2, w3, b3)

    out = qnetwork_forward(x, w1p, b1p, w2p, b2p, w3p, b3p, out_dim=out_dim)
    out = jax.block_until_ready(out)

    # Reference in plain JAX, with the same bf16-weight / f32-accumulate math.
    xb = x.astype(jnp.bfloat16)
    h1 = jnp.maximum(
        jnp.dot(xb, w1.astype(jnp.bfloat16), preferred_element_type=jnp.float32) + b1, 0.0)
    h2 = jnp.maximum(
        jnp.dot(h1.astype(jnp.bfloat16), w2.astype(jnp.bfloat16),
                preferred_element_type=jnp.float32) + b2, 0.0)
    ref = jnp.dot(h2.astype(jnp.bfloat16), w3.astype(jnp.bfloat16),
                  preferred_element_type=jnp.float32) + b3

    assert out.shape == (batch, output_dim)
    assert jnp.allclose(out, ref, atol=1e-2, rtol=1e-2), (
        f"max abs diff {jnp.max(jnp.abs(out - ref))}")

    print("KERNEL_OK")
</pallas_src>

<mosaic_0001>
module attributes {stable_mosaic.version = 11 : i64} {
  func.func @qnetwork_kernel(%arg0: i32, %arg1: memref<8x128xf32, #tpu.memory_space<vmem>>, %arg2: memref<128x256xbf16, #tpu.memory_space<vmem>>, %arg3: memref<1x256xf32, #tpu.memory_space<vmem>>, %arg4: memref<256x256xbf16, #tpu.memory_space<vmem>>, %arg5: memref<1x256xf32, #tpu.memory_space<vmem>>, %arg6: memref<256x128xbf16, #tpu.memory_space<vmem>>, %arg7: memref<1x128xf32, #tpu.memory_space<vmem>>, %arg8: memref<8x128xf32, #tpu.memory_space<vmem>>) attributes {dimension_semantics = [#tpu.dimension_semantics<parallel>], iteration_bounds = array<i64: 1>, scalar_prefetch = 0 : i64, scratch_operands = 0 : i64, tpu.core_type = #tpu.core_type<tc>, window_params = [{transform_indices = @transform_0, window_bounds = array<i64: 8, 128>}, {pipeline_mode = #tpu.pipeline_mode<synchronous>, transform_indices = @transform_1, window_bounds = array<i64: 128, 256>}, {pipeline_mode = #tpu.pipeline_mode<synchronous>, transform_indices = @transform_2, window_bounds = array<i64: 1, 256>}, {pipeline_mode = #tpu.pipeline_mode<synchronous>, transform_indices = @transform_3, window_bounds = array<i64: 256, 256>}, {pipeline_mode = #tpu.pipeline_mode<synchronous>, transform_indices = @transform_4, window_bounds = array<i64: 1, 256>}, {pipeline_mode = #tpu.pipeline_mode<synchronous>, transform_indices = @transform_5, window_bounds = array<i64: 256, 128>}, {pipeline_mode = #tpu.pipeline_mode<synchronous>, transform_indices = @transform_6, window_bounds = array<i64: 1, 128>}, {transform_indices = @transform_7, window_bounds = array<i64: 8, 128>}]} {
    %c0 = arith.constant 0 : index
    %c0_0 = arith.constant 0 : index
    %0 = vector.load %arg1[%c0, %c0_0] : memref<8x128xf32, #tpu.memory_space<vmem>>, vector<8x128xf32>
    %1 = arith.truncf %0 : vector<8x128xf32> to vector<8x128xbf16>
    %c0_1 = arith.constant 0 : index
    %c0_2 = arith.constant 0 : index
    %2 = vector.load %arg2[%c0_1, %c0_2] : memref<128x256xbf16, #tpu.memory_space<vmem>>, vector<128x256xbf16>
    %cst = arith.constant dense<0.000000e+00> : vector<8x256xf32>
    %3 = tpu.matmul %1, %2, %cst {dimension_numbers = #tpu.dot_dimension_numbers<[1], [0], [0], [1], [0, 0, 1, 1], [], []>} : vector<8x128xbf16>, vector<128x256xbf16>, vector<8x256xf32> -> vector<8x256xf32>
    %c0_3 = arith.constant 0 : index
    %c0_4 = arith.constant 0 : index
    %4 = vector.load %arg3[%c0_3, %c0_4] : memref<1x256xf32, #tpu.memory_space<vmem>>, vector<1x256xf32>
    %5 = vector.broadcast %4 : vector<1x256xf32> to vector<8x256xf32>
    %6 = arith.addf %3, %5 : vector<8x256xf32>
    %cst_5 = arith.constant 0.000000e+00 : f32
    %7 = vector.broadcast %cst_5 : f32 to vector<8x256xf32>
    %8 = arith.maximumf %6, %7 : vector<8x256xf32>
    %9 = arith.truncf %8 : vector<8x256xf32> to vector<8x256xbf16>
    %c0_6 = arith.constant 0 : index
    %c0_7 = arith.constant 0 : index
    %10 = vector.load %arg4[%c0_6, %c0_7] : memref<256x256xbf16, #tpu.memory_space<vmem>>, vector<256x256xbf16>
    %cst_8 = arith.constant dense<0.000000e+00> : vector<8x256xf32>
    %11 = tpu.matmul %9, %10, %cst_8 {dimension_numbers = #tpu.dot_dimension_numbers<[1], [0], [0], [1], [0, 0, 1, 1], [], []>} : vector<8x256xbf16>, vector<256x256xbf16>, vector<8x256xf32> -> vector<8x256xf32>
    %c0_9 = arith.constant 0 : index
    %c0_10 = arith.constant 0 : index
    %12 = vector.load %arg5[%c0_9, %c0_10] : memref<1x256xf32, #tpu.memory_space<vmem>>, vector<1x256xf32>
    %13 = vector.broadcast %12 : vector<1x256xf32> to vector<8x256xf32>
    %14 = arith.addf %11, %13 : vector<8x256xf32>
    %cst_11 = arith.constant 0.000000e+00 : f32
    %15 = vector.broadcast %cst_11 : f32 to vector<8x256xf32>
    %16 = arith.maximumf %14, %15 : vector<8x256xf32>
    %17 = arith.truncf %16 : vector<8x256xf32> to vector<8x256xbf16>
    %c0_12 = arith.constant 0 : index
    %c0_13 = arith.constant 0 : index
    %18 = vector.load %arg6[%c0_12, %c0_13] : memref<256x128xbf16, #tpu.memory_space<vmem>>, vector<256x128xbf16>
    %cst_14 = arith.constant dense<0.000000e+00> : vector<8x128xf32>
    %19 = tpu.matmul %17, %18, %cst_14 {dimension_numbers = #tpu.dot_dimension_numbers<[1], [0], [0], [1], [0, 0, 1, 1], [], []>} : vector<8x256xbf16>, vector<256x128xbf16>, vector<8x128xf32> -> vector<8x128xf32>
    %c0_15 = arith.constant 0 : index
    %c0_16 = arith.constant 0 : index
    %20 = vector.load %arg7[%c0_15, %c0_16] : memref<1x128xf32, #tpu.memory_space<vmem>>, vector<1x128xf32>
    %21 = vector.broadcast %20 : vector<1x128xf32> to vector<8x128xf32>
    %22 = arith.addf %19, %21 : vector<8x128xf32>
    %c0_17 = arith.constant 0 : index
    %c0_18 = arith.constant 0 : index
    %23 = vector.load %arg8[%c0_17, %c0_18] : memref<8x128xf32, #tpu.memory_space<vmem>>, vector<8x128xf32>
    tpu.vector_store %arg8[%c0_17, %c0_18], %22 {strides = array<i32>} : memref<8x128xf32, #tpu.memory_space<vmem>>, vector<8x128xf32>,
    return
  }
  func.func @transform_0(%arg0: i32) -> (i32, i32) {
    %c0_i32 = arith.constant 0 : i32
    %c0_i32_0 = arith.constant 0 : i32
    return %arg0, %c0_i32 : i32, i32
  }
  func.func @transform_1(%arg0: i32) -> (i32, i32) {
    %c0_i32 = arith.constant 0 : i32
    %c0_i32_0 = arith.constant 0 : i32
    %c0_i32_1 = arith.constant 0 : i32
    return %c0_i32, %c0_i32_0 : i32, i32
  }
  func.func @transform_2(%arg0: i32) -> (i32, i32) {
    %c0_i32 = arith.constant 0 : i32
    %c0_i32_0 = arith.constant 0 : i32
    %c0_i32_1 = arith.constant 0 : i32
    return %c0_i32, %c0_i32_0 : i32, i32
  }
  func.func @transform_3(%arg0: i32) -> (i32, i32) {
    %c0_i32 = arith.constant 0 : i32
    %c0_i32_0 = arith.constant 0 : i32
    %c0_i32_1 = arith.constant 0 : i32
    return %c0_i32, %c0_i32_0 : i32, i32
  }
  func.func @transform_4(%arg0: i32) -> (i32, i32) {
    %c0_i32 = arith.constant 0 : i32
    %c0_i32_0 = arith.constant 0 : i32
    %c0_i32_1 = arith.constant 0 : i32
    return %c0_i32, %c0_i32_0 : i32, i32
  }
  func.func @transform_5(%arg0: i32) -> (i32, i32) {
    %c0_i32 = arith.constant 0 : i32
    %c0_i32_0 = arith.constant 0 : i32
    %c0_i32_1 = arith.constant 0 : i32
    return %c0_i32, %c0_i32_0 : i32, i32
  }
  func.func @transform_6(%arg0: i32) -> (i32, i32) {
    %c0_i32 = arith.constant 0 : i32
    %c0_i32_0 = arith.constant 0 : i32
    %c0_i32_1 = arith.constant 0 : i32
    return %c0_i32, %c0_i32_0 : i32, i32
  }
  func.func @transform_7(%arg0: i32) -> (i32, i32) {
    %c0_i32 = arith.constant 0 : i32
    %c0_i32_0 = arith.constant 0 : i32
    return %arg0, %c0_i32 : i32, i32
  }
}

</mosaic_0001>

<bundles_post_ra>
// kernel: qnetwork_forward.1
= control target key start
LH: loop header
LB: loop body
LE: loop exit
PB: predicated region body
PF: predicated region fallthrough
CT: control target
= control target key end

     0   :  { %12 = vsyncpa [#allocation3], 0  ;;  %s1101_s0 = inlined_call_operand.vmem [shape: f32[8,128], index: 0, kind: input, shape index: {}]   ;;  %s1102_s1 = inlined_call_operand.hbm [shape: bf16[128,256], index: 1, kind: input, shape index: {}]   ;;  %s1103_s2 = inlined_call_operand.vmem [shape: f32[1,256], index: 2, kind: input, shape index: {}]   ;;  %s1104_s3 = inlined_call_operand.hbm [shape: bf16[256,256], index: 3, kind: input, shape index: {}]   ;;  %s1105_s4 = inlined_call_operand.vmem [shape: f32[1,256], index: 4, kind: input, shape index: {}]   ;;  %s1106_s5 = inlined_call_operand.hbm [shape: bf16[256,128], index: 5, kind: input, shape index: {}]   ;;  %s1107_s6 = inlined_call_operand.vmem [shape: f32[1,128], index: 6, kind: input, shape index: {}]   ;;  %s1108_s7 = inlined_call_operand.vmem [shape: f32[8,128], index: 7, kind: output, shape index: {}]  }
   0x1   :  { %13 = vsyncpa [#allocation5], 0  ;;  %s35_s26 = sshll.u32 %s1104_s3, 4  ;;  %s1030_s27 = smov [#allocation4]   ;;  %s36_s26 = int_to_ptr.hbm [resolvable:$true] %s35_s26 }
   0x2   :  { %s37_s28 = sshll.u32 %s1030_s27, 4  ;;  %s20_s8 = sshll.u32 %s1102_s1, 4  ;;  %s38_s28 = int_to_ptr.vmem [resolvable:$true] %s37_s28  ;;  %s21_s8 = int_to_ptr.hbm [resolvable:$true] %s20_s8 }
   0x3   :  { %s1031_s9 = smov 128   ;;  %s1032_s10 = smov 8  }
   0x4   :  { %43 = dma.hbm_to_vmem [thread:$0]  %s36_s26, 4096, %s38_s28, [#allocation5], %s1031_s9, %s1031_s9, %s1032_s10  }
   0x5   :  { %s1033_s11 = smov [#allocation2]   ;;  %s50_s15 = sshll.u32 %s1106_s5, 4  ;;  %s51_s15 = int_to_ptr.hbm [resolvable:$true] %s50_s15 }
   0x6   :  { %s22_s12 = sshll.u32 %s1033_s11, 4  ;;  %s1034_s3 = smov [#allocation6]   ;;  %s23_s12 = int_to_ptr.vmem [resolvable:$true] %s22_s12 }
   0x7   :  { %28 = dma.hbm_to_vmem [thread:$0]  %s21_s8, 2048, %s23_s12, [#allocation3], %s1031_s9, %s1031_s9, %s1032_s10  }
   0x8   :  { %s52_s16 = sshll.u32 %s1034_s3, 4  ;;  %s1035_s17 = smov 64   ;;  %s53_s16 = int_to_ptr.vmem [resolvable:$true] %s52_s16 }
   0x9   :  { %s1036_s18 = smov 4  }
   0xa   :  { %58 = dma.hbm_to_vmem [thread:$0]  %s51_s15, 2048, %s53_s16, [#allocation5], %s1035_s17, %s1035_s17, %s1036_s18  }
   0xb   :  { %1026 = dma.done.wait [#allocation3], 2048  }
   0xc   :  { %1027 = vsyncadd [#allocation3], 4294965248 }
   0xd   :  { %1028 = dma.done.wait [#allocation5], 6144  }
   0xe   :  { %1029 = vsyncadd [#allocation5], 4294961152  ;;  %v684_v0 = vld [vmem:[#allocation2 + $0x70] sm:$0xf]  ;;  %v897_v1 = vld [vmem:[#allocation2 + $0x74] sm:$0xf0] }
   0xf   :  { %v896_v2 = vld [vmem:[#allocation2 + $0x74] sm:$0xf]  ;;  %v685_v3 = vor.u32 %v897_v1, %v684_v0  ;;  %v686_v4 = vld [vmem:[#allocation2 + $0x78] sm:$0xf0]  ;;  %v676_v5 = vld [vmem:[#allocation2 + $0x60] sm:$0xf] }
  0x10   :  { %v895_v6 = vld [vmem:[#allocation2 + $0x64] sm:$0xf0]  ;;  %v689_v7 = vor.u32 %v896_v2, %v686_v4  ;;  %v894_v8 = vld [vmem:[#allocation2 + $0x64] sm:$0xf]  ;;  %v678_v9 = vld [vmem:[#allocation2 + $0x68] sm:$0xf0] }
  0x11   :  { %177 = vmatpush.bf16.msra.mxu0 %v685_v3  ;;  %v677_v10 = vor.u32 %v895_v6, %v676_v5  ;;  %v681_v11 = vor.u32 %v894_v8, %v678_v9  ;;  %v668_v12 = vld [vmem:[#allocation2 + $0x50] sm:$0xf]  ;;  %v893_v13 = vld [vmem:[#allocation2 + $0x54] sm:$0xf0]  ;;  %v892_v14 = vld [vmem:[#allocation2 + $0x54] sm:$0xf] }
  0x12   :  { %190 = vmatpush.bf16.msra.mxu1 %v689_v7  ;;  %v670_v15 = vld [vmem:[#allocation2 + $0x58] sm:$0xf0]  ;;  %v669_v16 = vor.u32 %v893_v13, %v668_v12  ;;  %v660_v18 = vld [vmem:[#allocation2 + $0x40] sm:$0xf]  ;;  %v891_v19 = vld [vmem:[#allocation2 + $0x44] sm:$0xf0] }
  0x13   :  { %v673_v17 = vor.u32 %v892_v14, %v670_v15  ;;  %v890_v20 = vld [vmem:[#allocation2 + $0x44] sm:$0xf]  ;;  %v662_v21 = vld [vmem:[#allocation2 + $0x48] sm:$0xf0]  ;;  %v661_v22 = vor.u32 %v891_v19, %v660_v18  ;;  %v748_v23 = vld [vmem:[#allocation4 + $0x70] sm:$0xf] }
  0x14   :  { %v913_v24 = vld [vmem:[#allocation4 + $0x74] sm:$0xf0]  ;;  %v812_v25 = vld [vmem:[#allocation4 + $0xf0] sm:$0xf]  ;;  %v665_v26 = vor.u32 %v890_v20, %v662_v21  ;;  %v888_v31 = vld [vmem:[#allocation2 + $0x34] sm:$0xf] }
  0x15   :  { %178 = vmatpush.bf16.msra.mxu0 %v677_v10  ;;  %v652_v27 = vld [vmem:[#allocation2 + $0x30] sm:$0xf]  ;;  %v889_v28 = vld [vmem:[#allocation2 + $0x34] sm:$0xf0]  ;;  %v749_v29 = vor.u32 %v913_v24, %v748_v23  ;;  %v654_v32 = vld [vmem:[#allocation2 + $0x38] sm:$0xf0] }
  0x16   :  { %191 = vmatpush.bf16.msra.mxu1 %v681_v11  ;;  %v929_v30 = vld [vmem:[#allocation4 + $0xf4] sm:$0xf0]  ;;  %v740_v34 = vld [vmem:[#allocation4 + $0x60] sm:$0xf]  ;;  %v911_v35 = vld [vmem:[#allocation4 + $0x64] sm:$0xf0]  ;;  %v653_v38 = vor.u32 %v889_v28, %v652_v27  ;;  %v657_v43 = vor.u32 %v888_v31, %v654_v32 }
  0x17   :  { %v813_v33 = vor.u32 %v929_v30, %v812_v25  ;;  %405 = vmatpush.bf16.msra.mxu2 %v749_v29  ;;  %v804_v36 = vld [vmem:[#allocation4 + $0xe0] sm:$0xf]  ;;  %v927_v37 = vld [vmem:[#allocation4 + $0xe4] sm:$0xf0]  ;;  %v741_v41 = vor.u32 %v911_v35, %v740_v34  ;;  %v886_v44 = vld [vmem:[#allocation2 + $0x24] sm:$0xf] }
  0x18   :  { %v644_v39 = vld [vmem:[#allocation2 + $0x20] sm:$0xf]  ;;  %v887_v40 = vld [vmem:[#allocation2 + $0x24] sm:$0xf0]  ;;  %v805_v42 = vor.u32 %v927_v37, %v804_v36  ;;  %v732_v45 = vld [vmem:[#allocation4 + $0x50] sm:$0xf] }
  0x19   :  { %179 = vmatpush.bf16.msra.mxu0 %v669_v16  ;;  %418 = vmatpush.bf16.msra.mxu3 %v813_v33  ;;  %v909_v46 = vld [vmem:[#allocation4 + $0x54] sm:$0xf0]  ;;  %v646_v47 = vld [vmem:[#allocation2 + $0x28] sm:$0xf0]  ;;  %v796_v48 = vld [vmem:[#allocation4 + $0xd0] sm:$0xf]  ;;  %v645_v51 = vor.u32 %v887_v40, %v644_v39 }
  0x1a   :  { %192 = vmatpush.bf16.msra.mxu1 %v673_v17  ;;  %v925_v49 = vld [vmem:[#allocation4 + $0xd4] sm:$0xf0]  ;;  %v733_v50 = vor.u32 %v909_v46, %v732_v45  ;;  %v636_v52 = vld [vmem:[#allocation2 + $0x10] sm:$0xf]  ;;  %v724_v54 = vld [vmem:[#allocation4 + $0x40] sm:$0xf]  ;;  %v649_v56 = vor.u32 %v886_v44, %v646_v47 }
  0x1b   :  { %406 = vmatpush.bf16.msra.mxu2 %v741_v41  ;;  %v797_v53 = vor.u32 %v925_v49, %v796_v48  ;;  %v907_v55 = vld [vmem:[#allocation4 + $0x44] sm:$0xf0]  ;;  %v885_v57 = vld [vmem:[#allocation2 + $0x14] sm:$0xf0]  ;;  %v788_v58 = vld [vmem:[#allocation4 + $0xc0] sm:$0xf] }
  0x1c   :  { %v923_v59 = vld [vmem:[#allocation4 + $0xc4] sm:$0xf0]  ;;  %v884_v60 = vld [vmem:[#allocation2 + $0x14] sm:$0xf]  ;;  %v638_v61 = vld [vmem:[#allocation2 + $0x18] sm:$0xf0]  ;;  %v725_v63 = vor.u32 %v907_v55, %v724_v54  ;;  %v637_v0 = vor.u32 %v885_v57, %v636_v52 }
  0x1d   :  { %180 = vmatpush.bf16.msra.mxu0 %v661_v22  ;;  %419 = vmatpush.bf16.msra.mxu3 %v805_v42  ;;  %v628_v62 = vld [vmem:[#allocation2] sm:$0xf]  ;;  %v883_v1 = vld [vmem:[#allocation2 + $0x4] sm:$0xf0]  ;;  %v789_v2 = vor.u32 %v923_v59, %v788_v58  ;;  %v716_v3 = vld [vmem:[#allocation4 + $0x30] sm:$0xf]  ;;  %v641_v5 = vor.u32 %v884_v60, %v638_v61 }
  0x1e   :  { %193 = vmatpush.bf16.msra.mxu1 %v665_v26  ;;  %v905_v4 = vld [vmem:[#allocation4 + $0x34] sm:$0xf0]  ;;  %v882_v6 = vld [vmem:[#allocation2 + $0x4] sm:$0xf]  ;;  %v780_v7 = vld [vmem:[#allocation4 + $0xb0] sm:$0xf]  ;;  %v629_v16 = vor.u32 %v883_v1, %v628_v62 }
  0x1f   :  { %407 = vmatpush.bf16.msra.mxu2 %v733_v50  ;;  %v921_v8 = vld [vmem:[#allocation4 + $0xb4] sm:$0xf0]  ;;  %v630_v9 = vld [vmem:[#allocation2 + $0x8] sm:$0xf0]  ;;  %v912_v10 = vld [vmem:[#allocation4 + $0x74] sm:$0xf]  ;;  %v717_v15 = vor.u32 %v905_v4, %v716_v3 }
  0x20   :  { %v750_v11 = vld [vmem:[#allocation4 + $0x78] sm:$0xf0]  ;;  %v73_v12 = vld [vmem:[%s1101_s0] sm:$0xff]  ;;  %v928_v13 = vld [vmem:[#allocation4 + $0xf4] sm:$0xf]  ;;  %v781_v17 = vor.u32 %v921_v8, %v780_v7  ;;  %v633_v20 = vor.u32 %v882_v6, %v630_v9 }
  0x21   :  { %181 = vmatpush.bf16.msra.mxu0 %v653_v38  ;;  %420 = vmatpush.bf16.msra.mxu3 %v797_v53  ;;  %v814_v14 = vld [vmem:[#allocation4 + $0xf8] sm:$0xf0]  ;;  %v708_v18 = vld [vmem:[#allocation4 + $0x20] sm:$0xf]  ;;  %v903_v19 = vld [vmem:[#allocation4 + $0x24] sm:$0xf0]  ;;  %v753_v21 = vor.u32 %v912_v10, %v750_v11  ;;  %v74_v27 = vpack.c.bf16 %v73_v12, %v73_v12 }
  0x22   :  { %194 = vmatpush.bf16.msra.mxu1 %v657_v43  ;;  %v772_v22 = vld [vmem:[#allocation4 + $0xa0] sm:$0xf]  ;;  %v919_v23 = vld [vmem:[#allocation4 + $0xa4] sm:$0xf0]  ;;  %v817_v24 = vor.u32 %v928_v13, %v814_v14  ;;  %v910_v25 = vld [vmem:[#allocation4 + $0x64] sm:$0xf]  ;;  %v709_v30 = vor.u32 %v903_v19, %v708_v18 }
  0x23   :  { %408 = vmatpush.bf16.msra.mxu2 %v725_v63  ;;  %v742_v26 = vld [vmem:[#allocation4 + $0x68] sm:$0xf0]  ;;  %v926_v28 = vld [vmem:[#allocation4 + $0xe4] sm:$0xf]  ;;  %v773_v31 = vor.u32 %v919_v23, %v772_v22  ;;  %v908_v34 = vld [vmem:[#allocation4 + $0x54] sm:$0xf] }
  0x24   :  { %v806_v29 = vld [vmem:[#allocation4 + $0xe8] sm:$0xf0]  ;;  %v745_v32 = vor.u32 %v910_v25, %v742_v26  ;;  %v734_v35 = vld [vmem:[#allocation4 + $0x58] sm:$0xf0]  ;;  %v924_v36 = vld [vmem:[#allocation4 + $0xd4] sm:$0xf] }
  0x25   :  { %182 = vmatpush.bf16.msra.mxu0 %v645_v51  ;;  %421 = vmatpush.bf16.msra.mxu3 %v789_v2  ;;  %v809_v33 = vor.u32 %v926_v28, %v806_v29  ;;  %v798_v37 = vld [vmem:[#allocation4 + $0xd8] sm:$0xf0]  ;;  %v737_v38 = vor.u32 %v908_v34, %v734_v35  ;;  %v906_v40 = vld [vmem:[#allocation4 + $0x44] sm:$0xf]  ;;  %v726_v41 = vld [vmem:[#allocation4 + $0x48] sm:$0xf0] }
  0x26   :  { %195 = vmatpush.bf16.msra.mxu1 %v649_v56  ;;  %v801_v39 = vor.u32 %v924_v36, %v798_v37  ;;  %v922_v42 = vld [vmem:[#allocation4 + $0xc4] sm:$0xf]  ;;  %v790_v43 = vld [vmem:[#allocation4 + $0xc8] sm:$0xf0]  ;;  %v729_v44 = vor.u32 %v906_v40, %v726_v41  ;;  %v904_v46 = vld [vmem:[#allocation4 + $0x34] sm:$0xf] }
  0x27   :  { %409 = vmatpush.bf16.msra.mxu2 %v717_v15  ;;  %v793_v45 = vor.u32 %v922_v42, %v790_v43  ;;  %v718_v47 = vld [vmem:[#allocation4 + $0x38] sm:$0xf0]  ;;  %v920_v48 = vld [vmem:[#allocation4 + $0xb4] sm:$0xf]  ;;  %v902_v52 = vld [vmem:[#allocation4 + $0x24] sm:$0xf] }
  0x28   :  { %v782_v49 = vld [vmem:[#allocation4 + $0xb8] sm:$0xf0]  ;;  %v721_v50 = vor.u32 %v904_v46, %v718_v47  ;;  %v710_v53 = vld [vmem:[#allocation4 + $0x28] sm:$0xf0]  ;;  %v918_v54 = vld [vmem:[#allocation4 + $0xa4] sm:$0xf] }
  0x29   :  { %183 = vmatpush.bf16.msra.mxu0 %v637_v0  ;;  %422 = vmatpush.bf16.msra.mxu3 %v781_v17  ;;  %v785_v51 = vor.u32 %v920_v48, %v782_v49  ;;  %v774_v55 = vld [vmem:[#allocation4 + $0xa8] sm:$0xf0]  ;;  %v713_v56 = vor.u32 %v902_v52, %v710_v53  ;;  %v700_v58 = vld [vmem:[#allocation4 + $0x10] sm:$0xf]  ;;  %v901_v59 = vld [vmem:[#allocation4 + $0x14] sm:$0xf0] }
  0x2a   :  { %196 = vmatpush.bf16.msra.mxu1 %v641_v5  ;;  %v777_v57 = vor.u32 %v918_v54, %v774_v55  ;;  %v764_v60 = vld [vmem:[#allocation4 + $0x90] sm:$0xf]  ;;  %v701_v61 = vor.u32 %v901_v59, %v700_v58  ;;  %v917_v62 = vld [vmem:[#allocation4 + $0x94] sm:$0xf0]  ;;  %v900_v63 = vld [vmem:[#allocation4 + $0x14] sm:$0xf] }
  0x2b   :  { %410 = vmatpush.bf16.msra.mxu2 %v709_v30  ;;  %v702_v0 = vld [vmem:[#allocation4 + $0x18] sm:$0xf0]  ;;  %v765_v1 = vor.u32 %v917_v62, %v764_v60  ;;  %v916_v3 = vld [vmem:[#allocation4 + $0x94] sm:$0xf]  ;;  %v692_v6 = vld [vmem:[#allocation4] sm:$0xf] }
  0x2c   :  { %v705_v2 = vor.u32 %v900_v63, %v702_v0  ;;  %v766_v4 = vld [vmem:[#allocation4 + $0x98] sm:$0xf0]  ;;  %v899_v7 = vld [vmem:[#allocation4 + $0x4] sm:$0xf0]  ;;  %v756_v8 = vld [vmem:[#allocation4 + $0x80] sm:$0xf] }
  0x2d   :  { %184 = vmatpush.bf16.msra.mxu0 %v629_v16  ;;  %423 = vmatpush.bf16.msra.mxu3 %v773_v31  ;;  %v769_v5 = vor.u32 %v916_v3, %v766_v4  ;;  %v693_v9 = vor.u32 %v899_v7, %v692_v6  ;;  %v915_v10 = vld [vmem:[#allocation4 + $0x84] sm:$0xf0]  ;;  %v898_v11 = vld [vmem:[#allocation4 + $0x4] sm:$0xf]  ;;  %v694_v12 = vld [vmem:[#allocation4 + $0x8] sm:$0xf0] }
  0x2e   :  { %197 = vmatpush.bf16.msra.mxu1 %v633_v20  ;;  %v757_v13 = vor.u32 %v915_v10, %v756_v8  ;;  %v697_v14 = vor.u32 %v898_v11, %v694_v12  ;;  %v914_v15 = vld [vmem:[#allocation4 + $0x84] sm:$0xf]  ;;  %v758_v16 = vld [vmem:[#allocation4 + $0x88] sm:$0xf0]  ;;  %v945_v18 = vld [vmem:[#allocation6 + $0x78] sm:$0xff] }
  0x2f   :  { %411 = vmatpush.bf16.msra.mxu2 %v701_v61  ;;  %v761_v17 = vor.u32 %v914_v15, %v758_v16  ;;  %v937_v19 = vld [vmem:[#allocation6 + $0x38] sm:$0xff]  ;;  %v944_v20 = vld [vmem:[#allocation6 + $0x70] sm:$0xff]  ;;  %v943_v22 = vld [vmem:[#allocation6 + $0x68] sm:$0xff] }
  0x30   :  { %185 = vmatmul.bf16.vlgmr.msra.gmra.mxu0 %v74_v27  ;;  %v935_v23 = vld [vmem:[#allocation6 + $0x28] sm:$0xff]  ;;  %v934_v25 = vld [vmem:[#allocation6 + $0x20] sm:$0xff]  ;;  %v941_v26 = vld [vmem:[#allocation6 + $0x58] sm:$0xff] }
  0x31   :  { %431 = vmatpush.bf16.msrb.mxu0 %v753_v21  ;;  %198 = vmatmul.bf16.vlgmr.msra.gmra.mxu1 %v74_v27  ;;  %v936_v21 = vld [vmem:[#allocation6 + $0x30] sm:$0xff]  ;;  %v91_v27 = vld [vmem:[%s1103_s2] sm:$0x3]  ;;  %v933_v41 = vld [vmem:[#allocation6 + $0x18] sm:$0xff] }
  0x32   :  { %444 = vmatpush.bf16.msrb.mxu1 %v817_v24  ;;  %424 = vmatpush.bf16.msra.mxu3 %v765_v1  ;;  %v942_v24 = vld [vmem:[#allocation6 + $0x60] sm:$0xff]  ;;  %v940_v28 = vld [vmem:[#allocation6 + $0x50] sm:$0xff]  ;;  %v93_v29 = vperm.slane %v91_v27, 0  ;;  %v94_v30 = vperm.slane %v91_v27, 1  ;;  %v939_v42 = vld [vmem:[#allocation6 + $0x48] sm:$0xff] }
  0x33   :  { %412 = vmatpush.bf16.msra.mxu2 %v693_v9  ;;  %v932_v43 = vld [vmem:[#allocation6 + $0x10] sm:$0xff]  ;;  %v930_v46 = vld [vmem:[#allocation6] sm:$0xff] }
  0x34   :  { %v239_v47 = vld [vmem:[%s1105_s4] sm:$0x3] }
  0x35   :  { %432 = vmatpush.bf16.msrb.mxu0 %v745_v32  ;;  %v242_v48 = vperm.slane %v239_v47, 1  ;;  %v241_v53 = vperm.slane %v239_v47, 0  ;;  %v953_v3 = vld [vmem:[%s1107_s6] ss:$0 sm:$0xff] }
  0x36   :  { %445 = vmatpush.bf16.msrb.mxu1 %v809_v33  ;;  %425 = vmatpush.bf16.msra.mxu3 %v757_v13 }
  0x37   :  { %593 = vmatpush.bf16.msrb.mxu2 %v937_v19 }
  0x39   :  { %433 = vmatpush.bf16.msrb.mxu0 %v737_v38 }
  0x3a   :  { %446 = vmatpush.bf16.msrb.mxu1 %v801_v39  ;;  %606 = vmatpush.bf16.msrb.mxu3 %v945_v18 }
  0x3b   :  { %594 = vmatpush.bf16.msrb.mxu2 %v936_v21 }
  0x3d   :  { %434 = vmatpush.bf16.msrb.mxu0 %v729_v44  ;;  %v938_v44 = vld [vmem:[#allocation6 + $0x40] sm:$0xff] }
  0x3e   :  { %447 = vmatpush.bf16.msrb.mxu1 %v793_v45  ;;  %607 = vmatpush.bf16.msrb.mxu3 %v944_v20  ;;  %v931_v45 = vld [vmem:[#allocation6 + $0x8] sm:$0xff] }
  0x3f   :  { %595 = vmatpush.bf16.msrb.mxu2 %v935_v23 }
  0x41   :  { %435 = vmatpush.bf16.msrb.mxu0 %v721_v50 }
  0x42   :  { %448 = vmatpush.bf16.msrb.mxu1 %v785_v51  ;;  %608 = vmatpush.bf16.msrb.mxu3 %v943_v22 }
  0x43   :  { %596 = vmatpush.bf16.msrb.mxu2 %v934_v25 }
  0x45   :  { %436 = vmatpush.bf16.msrb.mxu0 %v713_v56 }
  0x46   :  { %449 = vmatpush.bf16.msrb.mxu1 %v777_v57  ;;  %609 = vmatpush.bf16.msrb.mxu3 %v942_v24 }
  0x47   :  { %597 = vmatpush.bf16.msrb.mxu2 %v933_v41 }
  0x49   :  { %437 = vmatpush.bf16.msrb.mxu0 %v705_v2 }
  0x4a   :  { %450 = vmatpush.bf16.msrb.mxu1 %v769_v5  ;;  %610 = vmatpush.bf16.msrb.mxu3 %v941_v26 }
  0x4b   :  { %598 = vmatpush.bf16.msrb.mxu2 %v932_v43 }
  0x4d   :  { %438 = vmatpush.bf16.msrb.mxu0 %v697_v14 }
  0x4e   :  { %451 = vmatpush.bf16.msrb.mxu1 %v761_v17  ;;  %611 = vmatpush.bf16.msrb.mxu3 %v940_v28 }
  0x4f   :  { %599 = vmatpush.bf16.msrb.mxu2 %v931_v45 }
  0x52   :  { %612 = vmatpush.bf16.msrb.mxu3 %v939_v42 }
  0x53   :  { %600 = vmatpush.bf16.msrb.mxu2 %v930_v46 }
  0x56   :  { %613 = vmatpush.bf16.msrb.mxu3 %v938_v44 }
  0xad   :  { %v186_v31 = vpop.f32.mrf.mxu0 }
  0xae   :  { %v187_v32 = vadd.f32 %v186_v31, %v93_v29  ;;  %v199_v33 = vpop.f32.mrf.mxu1 }
  0xaf   :  { %v200_v34 = vadd.f32 %v199_v33, %v94_v30 }
  0xb0   :  { %v203_v35 = vmax.f32 %v187_v32, 0.0 }
  0xb1   :  { %v204_v36 = vmax.f32 %v200_v34, 0.0 }
  0xb2   :  { %v205_v37 = vpack.c.bf16 %v203_v35, %v203_v35 }
  0xb3   :  { %v206_v38 = vpack.c.bf16 %v204_v36, %v204_v36 }
  0xb4   :  { %413 = vmatmul.bf16.vlgmr.msra.gmra.mxu2 %v205_v37  ;;  %439 = vmatmul.bf16.vlgmr.msrb.gmra.mxu0 %v205_v37 }
  0xb5   :  { %426 = vmatmul.bf16.vlgmr.msra.gmra.mxu3 %v206_v38  ;;  %452 = vmatmul.bf16.vlgmr.msrb.gmra.mxu1 %v206_v38  ;;  %v188_v39 = vpop.f32.mrf.mxu0 }
  0xb6   :  { %v201_v40 = vpop.f32.mrf.mxu1 }
 0x131   :  { %v440_v49 = vpop.f32.mrf.mxu0 }
 0x132   :  { %v441_v50 = vadd.f32 %v440_v49, %v242_v48  ;;  %v453_v51 = vpop.f32.mrf.mxu1 }
 0x134   :  { %v454_v52 = vadd.f32 %v453_v51, %v441_v50 }
 0x136   :  { %v458_v54 = vmax.f32 %v454_v52, 0.0 }
 0x137   :  { %v414_v55 = vpop.f32.mrf.mxu2 }
 0x138   :  { %v460_v56 = vpack.c.bf16 %v458_v54, %v458_v54  ;;  %v415_v57 = vadd.f32 %v414_v55, %v241_v53  ;;  %v427_v58 = vpop.f32.mrf.mxu3 }
 0x139   :  { %v442_v59 = vpop.f32.mrf.mxu0 }
 0x13a   :  { %v428_v60 = vadd.f32 %v427_v58, %v415_v57  ;;  %v455_v61 = vpop.f32.mrf.mxu1  ;;  %614 = vmatmul.bf16.vlgmr.msrb.gmra.mxu3 %v460_v56 }
 0x13c   :  { %v457_v62 = vmax.f32 %v428_v60, 0.0 }
 0x13e   :  { %v459_v63 = vpack.c.bf16 %v457_v62, %v457_v62 }
 0x13f   :  { %v416_v0 = vpop.f32.mrf.mxu2 }
 0x140   :  { %v429_v1 = vpop.f32.mrf.mxu3  ;;  %601 = vmatmul.bf16.vlgmr.msrb.gmra.mxu2 %v459_v63 }
 0x1bd   :  { %v615_v2 = vpop.f32.mrf.mxu3 }
 0x1c3   :  { %v602_v4 = vpop.f32.mrf.mxu2 }
 0x1c4   :  { %v603_v5 = vadd.f32 %v953_v3, %v602_v4 }
 0x1c5   :  { %v617_v6 = vpop.f32.mrf.mxu3 }
 0x1c6   :  { %v616_v7 = vadd.f32 %v615_v2, %v603_v5 }
 0x1c8   :  { %619 = vst [vmem:[%s1108_s7] sm:$0xff] %v616_v7 }
 0x1cb   :  { %v604_v8 = vpop.f32.mrf.mxu2 }
 0x1cc   :  { %624 = vsyncpa [#allocation3], 1 }
 0x1cd   :  { %625 = vsyncpa [#allocation5], 1 }

</bundles_post_ra>
